<compile_context>
chip_gen: v7x
topology: tpu7x:2x2x1
jax: 0.10.0
libtpu: 0.0.40
codegen_flags: <defaults>
</compile_context>

<pallas_src>
import functools
import math

import numpy as np
import jax
import jax.numpy as jnp
from jax import lax
from jax.experimental import pallas as pl
from jax.experimental.pallas import tpu as pltpu


# ----------------------------------------------------------------------------
# Pallas kernel
# ----------------------------------------------------------------------------
def resblock_disc_kernel(x_ref, masks_ref, w1_ref, b1_ref, w2b_ref, b2b_ref,
                         out_ref, *, H, W, NB):
    # x_ref    : (Cpad, NB*H*W)       f32   channel-padded, lane-concatenated images
    # masks_ref: (9, 1, NB*H*W)       f32   per-tap border-validity masks (tiled NB x)
    # w1_ref   : (Cout, 9*Cpad)       bf16  packed conv1 weight
    # b1_ref   : (Cout, 1)            f32
    # w2b_ref  : (Cout, 9*Cout+Cpad)  bf16  packed [conv2 | 1x1 bypass] weight
    # b2b_ref  : (Cout, 1)            f32   b2 + b_bypass
    # out_ref  : (Cout, NB*H*W)       f32
    HW = H * W
    L = NB * HW

    w1 = w1_ref[...]
    w2b = w2b_ref[...]
    b1 = b1_ref[...]
    b2b = b2b_ref[...]
    masks = [masks_ref[t] for t in range(9)]          # each (1, L), loaded once

    x = x_ref[...]                                    # (Cpad, L) f32

    def tap_pieces(act):
        # act: (C, L) f32.  Returns the 9 shifted/masked copies (im2col rows of
        # a 3x3 / pad=1 conv) for all NB images at once.  Shifts are XLU lane
        # rotations, borders are zeroed with VPU mask multiplies; values that
        # wrap across image boundaries only ever land on masked positions.
        pieces = []
        for dh in range(3):
            for dw in range(3):
                t = dh * 3 + dw
                shift = ((1 - dh) * W + (1 - dw)) % L
                p = pltpu.roll(act, shift, axis=1) if shift else act
                if t != 4:                             # centre tap: no mask
                    p = p * masks[t]
                pieces.append(p)
        return pieces

    # ReLU -> conv1: one MXU contraction over K = 9*Cpad for the whole slab.
    xr = jnp.maximum(x, 0.0)
    p1 = jnp.concatenate(tap_pieces(xr), axis=0).astype(jnp.bfloat16)
    h1 = jnp.dot(w1, p1, preferred_element_type=jnp.float32) + b1
    h1 = jnp.maximum(h1, 0.0)                          # ReLU before conv2

    # conv2 + fused 1x1 bypass: one contraction over K = 9*Cout + Cpad.
    # The raw (un-ReLU'd) input rows are appended for the bypass path.
    p2 = jnp.concatenate(tap_pieces(h1) + [x], axis=0).astype(jnp.bfloat16)
    out = jnp.dot(w2b, p2, preferred_element_type=jnp.float32) + b2b

    out_ref[...] = out.astype(out_ref.dtype)


# ----------------------------------------------------------------------------
# Wrapper (layout plumbing + weight packing in glue)
# ----------------------------------------------------------------------------
def _round_up(x, m):
    return (x + m - 1) // m * m


def _border_masks(H, W):
    h = np.arange(H)[:, None]
    w = np.arange(W)[None, :]
    masks = np.empty((9, 1, H * W), np.float32)
    for dh in range(3):
        for dw in range(3):
            ok = ((h + dh - 1 >= 0) & (h + dh - 1 < H) &
                  (w + dw - 1 >= 0) & (w + dw - 1 < W))
            masks[dh * 3 + dw, 0] = ok.reshape(-1).astype(np.float32)
    return jnp.asarray(masks)


def _pack_conv3x3(w_oihw, cin_pad):
    # Pack OIHW -> (O, KH*KW*cin_pad) with tap-major, channel-minor column
    # order, matching the kernel's patch-row order.
    O, I, KH, KW = w_oihw.shape
    w = jnp.pad(w_oihw, ((0, 0), (0, cin_pad - I), (0, 0), (0, 0)))
    return jnp.transpose(w, (0, 2, 3, 1)).reshape(O, KH * KW * cin_pad)


def resblock_discriminator(x_nchw, params, images_per_step=None):
    """x_nchw: (N, Cin, H, W) f32.  params: OIHW weights + biases.
    Returns (N, Cout, H, W) f32."""
    w1, b1, w2, b2, wb, bb = params
    N, Cin, H, W = x_nchw.shape
    Cout = w1.shape[0]
    HW = H * W
    Cpad = _round_up(Cin, 8)
    NB = images_per_step if images_per_step is not None else math.gcd(N, 8)
    assert N % NB == 0, "batch must be divisible by images_per_step"
    L = NB * HW

    # activations: (Cpad, N*H*W) -- channels on sublanes, image-major flat
    # spatial on lanes (lane-dense slabs of NB images per grid step).
    x_cnl = jnp.transpose(x_nchw, (1, 0, 2, 3)).reshape(Cin, N * HW)
    x_cnl = x_cnl.astype(jnp.float32)
    if Cpad != Cin:
        x_cnl = jnp.pad(x_cnl, ((0, Cpad - Cin), (0, 0)))

    w1p = _pack_conv3x3(w1, Cpad).astype(jnp.bfloat16)               # (Cout, 9*Cpad)
    w2p = _pack_conv3x3(w2, Cout)                                    # (Cout, 9*Cout)
    wbp = jnp.pad(wb[:, :, 0, 0], ((0, 0), (0, Cpad - Cin)))         # (Cout, Cpad)
    w2b = jnp.concatenate([w2p, wbp], axis=1).astype(jnp.bfloat16)   # (Cout, 9*Cout+Cpad)
    b1c = b1.reshape(Cout, 1).astype(jnp.float32)
    b2c = (b2 + bb).reshape(Cout, 1).astype(jnp.float32)
    masks = jnp.tile(_border_masks(H, W), (1, 1, NB))                # (9, 1, L)

    K2 = 9 * Cout + Cpad
    kernel = functools.partial(resblock_disc_kernel, H=H, W=W, NB=NB)

    out = pl.pallas_call(
        kernel,
        out_shape=jax.ShapeDtypeStruct((Cout, N * HW), jnp.float32),
        grid_spec=pltpu.PrefetchScalarGridSpec(
            num_scalar_prefetch=0,
            grid=(N // NB,),
            in_specs=[
                pl.BlockSpec((Cpad, L), lambda i: (0, i)),
                pl.BlockSpec((9, 1, L), lambda i: (0, 0, 0)),
                pl.BlockSpec((Cout, 9 * Cpad), lambda i: (0, 0)),
                pl.BlockSpec((Cout, 1), lambda i: (0, 0)),
                pl.BlockSpec((Cout, K2), lambda i: (0, 0)),
                pl.BlockSpec((Cout, 1), lambda i: (0, 0)),
            ],
            out_specs=pl.BlockSpec((Cout, L), lambda i: (0, i)),
        ),
        compiler_params=pltpu.CompilerParams(
            dimension_semantics=("parallel",)),
    )(x_cnl, masks, w1p, b1c, w2b, b2c)

    # (Cout, N*H*W) -> NCHW
    return jnp.transpose(out.reshape(Cout, N, H, W), (1, 0, 2, 3))


# ----------------------------------------------------------------------------
# Deterministic parameter construction (mirrors the module's __init__).
# ----------------------------------------------------------------------------
def xavier_uniform(key, shape_oihw, gain):
    cout, cin, kh, kw = shape_oihw
    fan_in = cin * kh * kw
    fan_out = cout * kh * kw
    bound = gain * np.sqrt(6.0 / (fan_in + fan_out))
    return jax.random.uniform(key, shape_oihw, jnp.float32, -bound, bound)


def conv_bias(key, cout, fan_in):
    bound = 1.0 / np.sqrt(fan_in)
    return jax.random.uniform(key, (cout,), jnp.float32, -bound, bound)


def spectral_normalize(w_oihw, key, n_iter=1, eps=1e-12):
    # PyTorch spectral_norm: power iteration on W.view(Cout, -1).
    cout = w_oihw.shape[0]
    wmat = w_oihw.reshape(cout, -1)
    u = jax.random.normal(key, (cout,), jnp.float32)
    u = u / (jnp.linalg.norm(u) + eps)
    v = None
    for _ in range(n_iter):
        v = wmat.T @ u
        v = v / (jnp.linalg.norm(v) + eps)
        u = wmat @ v
        u = u / (jnp.linalg.norm(u) + eps)
    sigma = u @ (wmat @ v)
    return w_oihw / sigma


def make_params(key, in_channels, out_channels):
    ks = jax.random.split(key, 9)
    w1 = xavier_uniform(ks[0], (out_channels, in_channels, 3, 3), np.sqrt(2.0))
    w2 = xavier_uniform(ks[1], (out_channels, out_channels, 3, 3), np.sqrt(2.0))
    wb = xavier_uniform(ks[2], (out_channels, in_channels, 1, 1), 1.0)
    b1 = conv_bias(ks[3], out_channels, in_channels * 9)
    b2 = conv_bias(ks[4], out_channels, out_channels * 9)
    bb = conv_bias(ks[5], out_channels, in_channels)
    w1 = spectral_normalize(w1, ks[6])
    w2 = spectral_normalize(w2, ks[7])
    wb = spectral_normalize(wb, ks[8])
    return (w1, b1, w2, b2, wb, bb)          # OIHW weights + biases


# ----------------------------------------------------------------------------
# Pure-JAX reference (lax.conv, f32) for correctness.
# ----------------------------------------------------------------------------
def reference(x_nchw, params):
    w1, b1, w2, b2, wb, bb = params
    dn = ("NCHW", "OIHW", "NCHW")

    def conv(h, w, pad):
        return lax.conv_general_dilated(h, w, (1, 1), ((pad, pad), (pad, pad)),
                                        dimension_numbers=dn)

    h = jnp.maximum(x_nchw, 0.0)
    h = conv(h, w1, 1) + b1[None, :, None, None]
    h = jnp.maximum(h, 0.0)
    h = conv(h, w2, 1) + b2[None, :, None, None]
    byp = conv(x_nchw, wb, 0) + bb[None, :, None, None]
    return h + byp


if __name__ == "__main__":
    key = jax.random.PRNGKey(0)
    kx, kp = jax.random.split(key)

    N, Cin, Cout, H, W = 2, 4, 8, 16, 16     # stride=1 config
    x = jax.random.normal(kx, (N, Cin, H, W), jnp.float32)
    params = make_params(kp, Cin, Cout)

    out = jax.jit(resblock_discriminator)(x, params)
    out = jax.block_until_ready(out)

    ref = jax.block_until_ready(reference(x, params))
    assert out.shape == (N, Cout, H, W)
    max_err = float(jnp.max(jnp.abs(out - ref)))
    # bf16 dot inputs with f32 accumulation -> small quantization error vs f32 ref
    assert jnp.allclose(out, ref, atol=2e-2, rtol=2e-2), \
        f"mismatch vs lax.conv reference (max abs err {max_err})"

    print("KERNEL_OK")
</pallas_src>

<mosaic_0001>
module attributes {stable_mosaic.version = 11 : i64} {
  func.func @resblock_disc_kernel(%arg0: i32, %arg1: memref<8x512xf32, #tpu.memory_space<vmem>>, %arg2: memref<9x1x512xf32, #tpu.memory_space<vmem>>, %arg3: memref<8x72xbf16, #tpu.memory_space<vmem>>, %arg4: memref<8x1xf32, #tpu.memory_space<vmem>>, %arg5: memref<8x80xbf16, #tpu.memory_space<vmem>>, %arg6: memref<8x1xf32, #tpu.memory_space<vmem>>, %arg7: memref<8x512xf32, #tpu.memory_space<vmem>>) attributes {dimension_semantics = [#tpu.dimension_semantics<parallel>], iteration_bounds = array<i64: 1>, scalar_prefetch = 0 : i64, scratch_operands = 0 : i64, tpu.core_type = #tpu.core_type<tc>, window_params = [{transform_indices = @transform_0, window_bounds = array<i64: 8, 512>}, {pipeline_mode = #tpu.pipeline_mode<synchronous>, transform_indices = @transform_1, window_bounds = array<i64: 9, 1, 512>}, {pipeline_mode = #tpu.pipeline_mode<synchronous>, transform_indices = @transform_2, window_bounds = array<i64: 8, 72>}, {pipeline_mode = #tpu.pipeline_mode<synchronous>, transform_indices = @transform_3, window_bounds = array<i64: 8, 1>}, {pipeline_mode = #tpu.pipeline_mode<synchronous>, transform_indices = @transform_4, window_bounds = array<i64: 8, 80>}, {pipeline_mode = #tpu.pipeline_mode<synchronous>, transform_indices = @transform_5, window_bounds = array<i64: 8, 1>}, {transform_indices = @transform_6, window_bounds = array<i64: 8, 512>}]} {
    %c0 = arith.constant 0 : index
    %c0_0 = arith.constant 0 : index
    %0 = vector.load %arg3[%c0, %c0_0] : memref<8x72xbf16, #tpu.memory_space<vmem>>, vector<8x72xbf16>
    %c0_1 = arith.constant 0 : index
    %c0_2 = arith.constant 0 : index
    %1 = vector.load %arg5[%c0_1, %c0_2] : memref<8x80xbf16, #tpu.memory_space<vmem>>, vector<8x80xbf16>
    %c0_3 = arith.constant 0 : index
    %c0_4 = arith.constant 0 : index
    %2 = vector.load %arg4[%c0_3, %c0_4] : memref<8x1xf32, #tpu.memory_space<vmem>>, vector<8x1xf32>
    %c0_5 = arith.constant 0 : index
    %c0_6 = arith.constant 0 : index
    %3 = vector.load %arg6[%c0_5, %c0_6] : memref<8x1xf32, #tpu.memory_space<vmem>>, vector<8x1xf32>
    %c0_7 = arith.constant 0 : index
    %c0_8 = arith.constant 0 : index
    %c0_9 = arith.constant 0 : index
    %4 = vector.load %arg2[%c0_7, %c0_8, %c0_9] : memref<9x1x512xf32, #tpu.memory_space<vmem>>, vector<1x1x512xf32>
    %5 = vector.shape_cast %4 : vector<1x1x512xf32> to vector<1x512xf32>
    %c1 = arith.constant 1 : index
    %c0_10 = arith.constant 0 : index
    %c0_11 = arith.constant 0 : index
    %6 = vector.load %arg2[%c1, %c0_10, %c0_11] : memref<9x1x512xf32, #tpu.memory_space<vmem>>, vector<1x1x512xf32>
    %7 = vector.shape_cast %6 : vector<1x1x512xf32> to vector<1x512xf32>
    %c2 = arith.constant 2 : index
    %c0_12 = arith.constant 0 : index
    %c0_13 = arith.constant 0 : index
    %8 = vector.load %arg2[%c2, %c0_12, %c0_13] : memref<9x1x512xf32, #tpu.memory_space<vmem>>, vector<1x1x512xf32>
    %9 = vector.shape_cast %8 : vector<1x1x512xf32> to vector<1x512xf32>
    %c3 = arith.constant 3 : index
    %c0_14 = arith.constant 0 : index
    %c0_15 = arith.constant 0 : index
    %10 = vector.load %arg2[%c3, %c0_14, %c0_15] : memref<9x1x512xf32, #tpu.memory_space<vmem>>, vector<1x1x512xf32>
    %11 = vector.shape_cast %10 : vector<1x1x512xf32> to vector<1x512xf32>
    %c5 = arith.constant 5 : index
    %c0_16 = arith.constant 0 : index
    %c0_17 = arith.constant 0 : index
    %12 = vector.load %arg2[%c5, %c0_16, %c0_17] : memref<9x1x512xf32, #tpu.memory_space<vmem>>, vector<1x1x512xf32>
    %13 = vector.shape_cast %12 : vector<1x1x512xf32> to vector<1x512xf32>
    %c6 = arith.constant 6 : index
    %c0_18 = arith.constant 0 : index
    %c0_19 = arith.constant 0 : index
    %14 = vector.load %arg2[%c6, %c0_18, %c0_19] : memref<9x1x512xf32, #tpu.memory_space<vmem>>, vector<1x1x512xf32>
    %15 = vector.shape_cast %14 : vector<1x1x512xf32> to vector<1x512xf32>
    %c7 = arith.constant 7 : index
    %c0_20 = arith.constant 0 : index
    %c0_21 = arith.constant 0 : index
    %16 = vector.load %arg2[%c7, %c0_20, %c0_21] : memref<9x1x512xf32, #tpu.memory_space<vmem>>, vector<1x1x512xf32>
    %17 = vector.shape_cast %16 : vector<1x1x512xf32> to vector<1x512xf32>
    %c8 = arith.constant 8 : index
    %c0_22 = arith.constant 0 : index
    %c0_23 = arith.constant 0 : index
    %18 = vector.load %arg2[%c8, %c0_22, %c0_23] : memref<9x1x512xf32, #tpu.memory_space<vmem>>, vector<1x1x512xf32>
    %19 = vector.shape_cast %18 : vector<1x1x512xf32> to vector<1x512xf32>
    %c0_24 = arith.constant 0 : index
    %c0_25 = arith.constant 0 : index
    %20 = vector.load %arg1[%c0_24, %c0_25] : memref<8x512xf32, #tpu.memory_space<vmem>>, vector<8x512xf32>
    %cst = arith.constant 0.000000e+00 : f32
    %21 = vector.broadcast %cst : f32 to vector<8x512xf32>
    %22 = arith.maximumf %20, %21 : vector<8x512xf32>
    %c17_i32 = arith.constant 17 : i32
    %23 = tpu.dynamic_rotate %22 by %c17_i32 dim 1 : vector<8x512xf32>, i32 -> vector<8x512xf32>
    %24 = vector.broadcast %5 : vector<1x512xf32> to vector<8x512xf32>
    %25 = arith.mulf %23, %24 : vector<8x512xf32>
    %c16_i32 = arith.constant 16 : i32
    %26 = tpu.dynamic_rotate %22 by %c16_i32 dim 1 : vector<8x512xf32>, i32 -> vector<8x512xf32>
    %27 = vector.broadcast %7 : vector<1x512xf32> to vector<8x512xf32>
    %28 = arith.mulf %26, %27 : vector<8x512xf32>
    %c15_i32 = arith.constant 15 : i32
    %29 = tpu.dynamic_rotate %22 by %c15_i32 dim 1 : vector<8x512xf32>, i32 -> vector<8x512xf32>
    %30 = vector.broadcast %9 : vector<1x512xf32> to vector<8x512xf32>
    %31 = arith.mulf %29, %30 : vector<8x512xf32>
    %c1_i32 = arith.constant 1 : i32
    %32 = tpu.dynamic_rotate %22 by %c1_i32 dim 1 : vector<8x512xf32>, i32 -> vector<8x512xf32>
    %33 = vector.broadcast %11 : vector<1x512xf32> to vector<8x512xf32>
    %34 = arith.mulf %32, %33 : vector<8x512xf32>
    %c511_i32 = arith.constant 511 : i32
    %35 = tpu.dynamic_rotate %22 by %c511_i32 dim 1 : vector<8x512xf32>, i32 -> vector<8x512xf32>
    %36 = vector.broadcast %13 : vector<1x512xf32> to vector<8x512xf32>
    %37 = arith.mulf %35, %36 : vector<8x512xf32>
    %c497_i32 = arith.constant 497 : i32
    %38 = tpu.dynamic_rotate %22 by %c497_i32 dim 1 : vector<8x512xf32>, i32 -> vector<8x512xf32>
    %39 = vector.broadcast %15 : vector<1x512xf32> to vector<8x512xf32>
    %40 = arith.mulf %38, %39 : vector<8x512xf32>
    %c496_i32 = arith.constant 496 : i32
    %41 = tpu.dynamic_rotate %22 by %c496_i32 dim 1 : vector<8x512xf32>, i32 -> vector<8x512xf32>
    %42 = vector.broadcast %17 : vector<1x512xf32> to vector<8x512xf32>
    %43 = arith.mulf %41, %42 : vector<8x512xf32>
    %c495_i32 = arith.constant 495 : i32
    %44 = tpu.dynamic_rotate %22 by %c495_i32 dim 1 : vector<8x512xf32>, i32 -> vector<8x512xf32>
    %45 = vector.broadcast %19 : vector<1x512xf32> to vector<8x512xf32>
    %46 = arith.mulf %44, %45 : vector<8x512xf32>
    %47 = tpu.concatenate %25, %28, %31, %34, %22, %37, %40, %43, %46 in 0 : vector<8x512xf32>, vector<8x512xf32>, vector<8x512xf32>, vector<8x512xf32>, vector<8x512xf32>, vector<8x512xf32>, vector<8x512xf32>, vector<8x512xf32>, vector<8x512xf32> -> vector<72x512xf32>
    %48 = arith.truncf %47 : vector<72x512xf32> to vector<72x512xbf16>
    %cst_26 = arith.constant dense<0.000000e+00> : vector<8x512xf32>
    %49 = tpu.matmul %0, %48, %cst_26 {dimension_numbers = #tpu.dot_dimension_numbers<[1], [0], [0], [1], [0, 0, 1, 1], [], []>} : vector<8x72xbf16>, vector<72x512xbf16>, vector<8x512xf32> -> vector<8x512xf32>
    %50 = vector.broadcast %2 : vector<8x1xf32> to vector<8x512xf32>
    %51 = arith.addf %49, %50 : vector<8x512xf32>
    %cst_27 = arith.constant 0.000000e+00 : f32
    %52 = vector.broadcast %cst_27 : f32 to vector<8x512xf32>
    %53 = arith.maximumf %51, %52 : vector<8x512xf32>
    %c17_i32_28 = arith.constant 17 : i32
    %54 = tpu.dynamic_rotate %53 by %c17_i32_28 dim 1 : vector<8x512xf32>, i32 -> vector<8x512xf32>
    %55 = vector.broadcast %5 : vector<1x512xf32> to vector<8x512xf32>
    %56 = arith.mulf %54, %55 : vector<8x512xf32>
    %c16_i32_29 = arith.constant 16 : i32
    %57 = tpu.dynamic_rotate %53 by %c16_i32_29 dim 1 : vector<8x512xf32>, i32 -> vector<8x512xf32>
    %58 = vector.broadcast %7 : vector<1x512xf32> to vector<8x512xf32>
    %59 = arith.mulf %57, %58 : vector<8x512xf32>
    %c15_i32_30 = arith.constant 15 : i32
    %60 = tpu.dynamic_rotate %53 by %c15_i32_30 dim 1 : vector<8x512xf32>, i32 -> vector<8x512xf32>
    %61 = vector.broadcast %9 : vector<1x512xf32> to vector<8x512xf32>
    %62 = arith.mulf %60, %61 : vector<8x512xf32>
    %c1_i32_31 = arith.constant 1 : i32
    %63 = tpu.dynamic_rotate %53 by %c1_i32_31 dim 1 : vector<8x512xf32>, i32 -> vector<8x512xf32>
    %64 = vector.broadcast %11 : vector<1x512xf32> to vector<8x512xf32>
    %65 = arith.mulf %63, %64 : vector<8x512xf32>
    %c511_i32_32 = arith.constant 511 : i32
    %66 = tpu.dynamic_rotate %53 by %c511_i32_32 dim 1 : vector<8x512xf32>, i32 -> vector<8x512xf32>
    %67 = vector.broadcast %13 : vector<1x512xf32> to vector<8x512xf32>
    %68 = arith.mulf %66, %67 : vector<8x512xf32>
    %c497_i32_33 = arith.constant 497 : i32
    %69 = tpu.dynamic_rotate %53 by %c497_i32_33 dim 1 : vector<8x512xf32>, i32 -> vector<8x512xf32>
    %70 = vector.broadcast %15 : vector<1x512xf32> to vector<8x512xf32>
    %71 = arith.mulf %69, %70 : vector<8x512xf32>
    %c496_i32_34 = arith.constant 496 : i32
    %72 = tpu.dynamic_rotate %53 by %c496_i32_34 dim 1 : vector<8x512xf32>, i32 -> vector<8x512xf32>
    %73 = vector.broadcast %17 : vector<1x512xf32> to vector<8x512xf32>
    %74 = arith.mulf %72, %73 : vector<8x512xf32>
    %c495_i32_35 = arith.constant 495 : i32
    %75 = tpu.dynamic_rotate %53 by %c495_i32_35 dim 1 : vector<8x512xf32>, i32 -> vector<8x512xf32>
    %76 = vector.broadcast %19 : vector<1x512xf32> to vector<8x512xf32>
    %77 = arith.mulf %75, %76 : vector<8x512xf32>
    %78 = tpu.concatenate %56, %59, %62, %65, %53, %68, %71, %74, %77, %20 in 0 : vector<8x512xf32>, vector<8x512xf32>, vector<8x512xf32>, vector<8x512xf32>, vector<8x512xf32>, vector<8x512xf32>, vector<8x512xf32>, vector<8x512xf32>, vector<8x512xf32>, vector<8x512xf32> -> vector<80x512xf32>
    %79 = arith.truncf %78 : vector<80x512xf32> to vector<80x512xbf16>
    %cst_36 = arith.constant dense<0.000000e+00> : vector<8x512xf32>
    %80 = tpu.matmul %1, %79, %cst_36 {dimension_numbers = #tpu.dot_dimension_numbers<[1], [0], [0], [1], [0, 0, 1, 1], [], []>} : vector<8x80xbf16>, vector<80x512xbf16>, vector<8x512xf32> -> vector<8x512xf32>
    %81 = vector.broadcast %3 : vector<8x1xf32> to vector<8x512xf32>
    %82 = arith.addf %80, %81 : vector<8x512xf32>
    %c0_37 = arith.constant 0 : index
    %c0_38 = arith.constant 0 : index
    %83 = vector.load %arg7[%c0_37, %c0_38] : memref<8x512xf32, #tpu.memory_space<vmem>>, vector<8x512xf32>
    tpu.vector_store %arg7[%c0_37, %c0_38], %82 {strides = array<i32>} : memref<8x512xf32, #tpu.memory_space<vmem>>, vector<8x512xf32>,
    return
  }
  func.func @transform_0(%arg0: i32) -> (i32, i32) {
    %c0_i32 = arith.constant 0 : i32
    %c0_i32_0 = arith.constant 0 : i32
    return %c0_i32, %arg0 : i32, i32
  }
  func.func @transform_1(%arg0: i32) -> (i32, i32, i32) {
    %c0_i32 = arith.constant 0 : i32
    %c0_i32_0 = arith.constant 0 : i32
    %c0_i32_1 = arith.constant 0 : i32
    %c0_i32_2 = arith.constant 0 : i32
    return %c0_i32, %c0_i32_0, %c0_i32_1 : i32, i32, i32
  }
  func.func @transform_2(%arg0: i32) -> (i32, i32) {
    %c0_i32 = arith.constant 0 : i32
    %c0_i32_0 = arith.constant 0 : i32
    %c0_i32_1 = arith.constant 0 : i32
    return %c0_i32, %c0_i32_0 : i32, i32
  }
  func.func @transform_3(%arg0: i32) -> (i32, i32) {
    %c0_i32 = arith.constant 0 : i32
    %c0_i32_0 = arith.constant 0 : i32
    %c0_i32_1 = arith.constant 0 : i32
    return %c0_i32, %c0_i32_0 : i32, i32
  }
  func.func @transform_4(%arg0: i32) -> (i32, i32) {
    %c0_i32 = arith.constant 0 : i32
    %c0_i32_0 = arith.constant 0 : i32
    %c0_i32_1 = arith.constant 0 : i32
    return %c0_i32, %c0_i32_0 : i32, i32
  }
  func.func @transform_5(%arg0: i32) -> (i32, i32) {
    %c0_i32 = arith.constant 0 : i32
    %c0_i32_0 = arith.constant 0 : i32
    %c0_i32_1 = arith.constant 0 : i32
    return %c0_i32, %c0_i32_0 : i32, i32
  }
  func.func @transform_6(%arg0: i32) -> (i32, i32) {
    %c0_i32 = arith.constant 0 : i32
    %c0_i32_0 = arith.constant 0 : i32
    return %c0_i32, %arg0 : i32, i32
  }
}

</mosaic_0001>

<bundles_post_ra>
// kernel: resblock_discriminator.1
= control target key start
LH: loop header
LB: loop body
LE: loop exit
PB: predicated region body
PF: predicated region fallthrough
CT: control target
= control target key end

     0   :  { %s755_s29 = smov 17   ;;  %s757_s30 = smov 15   ;;  %v762_v8 = vmov 0   ;;  %v59_v10 = vlaneseq  ;;  %vm386_vm8 = vcmask 1043456   ;;  %vm382_vm9 = vcmask 588800   ;;  %s1338_s0 = inlined_call_operand.vmem [shape: f32[8,512], index: 0, kind: input, shape index: {}]   ;;  %s1339_s3 = inlined_call_operand.vmem [shape: f32[8,1], index: 3, kind: input, shape index: {}]   ;;  %s1340_s1 = inlined_call_operand.vmem [shape: f32[9,1,512], index: 1, kind: input, shape index: {}]   ;;  %s1341_s2 = inlined_call_operand.vmem [shape: bf16[8,72], index: 2, kind: input, shape index: {}]   ;;  %s1342_s5 = inlined_call_operand.vmem [shape: f32[8,1], index: 5, kind: input, shape index: {}]   ;;  %s1343_s4 = inlined_call_operand.vmem [shape: bf16[8,80], index: 4, kind: input, shape index: {}]   ;;  %s1344_s6 = inlined_call_operand.vmem [shape: f32[8,512], index: 6, kind: output, shape index: {}]  }
   0x1   :  { %v802_v0 = vld [vmem:[%s1338_s0 + $0x10] sm:$0xff]  ;;  %v807_v1 = vld [vmem:[%s1338_s0] sm:$0xff]  ;;  %v812_v2 = vld [vmem:[%s1338_s0 + $0x18] sm:$0xff]  ;;  %s758_s7 = smov 1   ;;  %s759_s8 = smov 127   ;;  %431 = vmatprep.mubr.bf16.mxu0 %v762_v8  ;;  %472 = vmatprep.mubr.bf16.mxu1 %v762_v8  ;;  %vm638_vm10 = vcmask 654336  }
   0x2   :  { %v815_v3 = vmax.f32 %v802_v0, 0.0  ;;  %v818_v4 = vmax.f32 %v807_v1, 0.0  ;;  %v823_v5 = vld [vmem:[%s1338_s0 + $0x8] sm:$0xff]  ;;  %v830_v6 = vmax.f32 %v812_v2, 0.0  ;;  %s756_s0 = smov 16   ;;  %s760_s9 = smov 113   ;;  %754 = vset.pattern.permute.xlu0 %v762_v8 }
   0x3   :  { %v833_v7 = vmax.f32 %v823_v5, 0.0  ;;  %s761_s10 = smov 112   ;;  %s763_s11 = smov 111   ;;  %v26_v9 = vld [vmem:[%s1339_s3] sm:$0xff]  ;;  %v68_v11 = vshrl.u32 %v59_v10, 7  ;;  %v901_v14 = vand.u32 127, %v59_v10 }
   0x4   :  { %55 = vrot.lane.b32.xlu1 %v815_v3, %s755_s29  ;;  %51 = vrot.lane.b32.xlu0 %v818_v4, %s755_s29  ;;  %v28_v16 = vld [vmem:[%s1340_s1] sm:$0xf]  ;;  %v732_v17 = vld [vmem:[%s1340_s1 + $0x4] sm:$0xf] }
   0x5   :  { %v903_v15 = vsub.s32 1, %v68_v11  ;;  %vm61_vm0 = vcmp.lt.s32.totalorder %v901_v14, 17  ;;  %v912_v18 = vsub.s32 0, %v68_v11  ;;  %v914_v20 = vsub.s32 2, %v68_v11  ;;  %v733_v57 = vld [vmem:[%s1340_s1 + $0x8] sm:$0xf] }
   0x6   :  { %v916_v22 = vsub.s32 3, %v68_v11  ;;  %vm99_vm1 = vcmp.lt.s32.totalorder %v901_v14, 16  ;;  %v734_v58 = vld [vmem:[%s1340_s1 + $0xc] sm:$0xf]  ;;  %vm137_vm2 = vcmp.lt.s32.totalorder %v901_v14, 15  ;;  %vm175_vm3 = vcmp.lt.s32.totalorder %v901_v14, 1 }
   0x7   :  { %v920_v23 = vrot.slane %v28_v16, %v903_v15  ;;  %v923_v24 = vrot.slane %v732_v17, %v903_v15  ;;  %v928_v26 = vrot.slane %v28_v16, %v912_v18  ;;  %v931_v27 = vrot.slane %v28_v16, %v914_v20 }
   0x8   :  { %57 = vrot.lane.b32.xlu1 %v830_v6, %s755_s29  ;;  %53 = vrot.lane.b32.xlu0 %v833_v7, %s755_s29  ;;  %v934_v30 = vrot.slane %v732_v17, %v912_v18  ;;  %v941_v33 = vrot.slane %v732_v17, %v914_v20  ;;  %v944_v34 = vrot.slane %v28_v16, %v916_v22  ;;  %vm213_vm4 = vcmp.lt.s32.totalorder %v901_v14, 127 }
   0x9   :  { %v951_v38 = vrot.slane %v732_v17, %v916_v22  ;;  %v975_v61 = vrot.slane %v733_v57, %v903_v15  ;;  %v979_v62 = vrot.slane %v734_v58, %v903_v15  ;;  %v987_v10 = vrot.slane %v733_v57, %v914_v20 }
   0xa   :  { %v990_v11 = vrot.slane %v733_v57, %v916_v22  ;;  %vm289_vm5 = vcmp.lt.s32.totalorder %v901_v14, 112  ;;  %vm251_vm6 = vcmp.lt.s32.totalorder %v901_v14, 113  ;;  %vm327_vm7 = vcmp.lt.s32.totalorder %v901_v14, 111 }
   0xc   :  { %93 = vrot.lane.b32.xlu1 %v833_v7, %s756_s0  ;;  %91 = vrot.lane.b32.xlu0 %v818_v4, %s756_s0 }
  0x10   :  { %97 = vrot.lane.b32.xlu1 %v830_v6, %s756_s0  ;;  %95 = vrot.lane.b32.xlu0 %v815_v3, %s756_s0 }
  0x14   :  { %131 = vrot.lane.b32.xlu1 %v833_v7, %s757_s30  ;;  %129 = vrot.lane.b32.xlu0 %v818_v4, %s757_s30 }
  0x18   :  { %135 = vrot.lane.b32.xlu1 %v830_v6, %s757_s30  ;;  %133 = vrot.lane.b32.xlu0 %v815_v3, %s757_s30 }
  0x1c   :  { %169 = vrot.lane.b32.xlu1 %v833_v7, %s758_s7  ;;  %167 = vrot.lane.b32.xlu0 %v818_v4, %s758_s7 }
  0x20   :  { %173 = vrot.lane.b32.xlu1 %v830_v6, %s758_s7  ;;  %171 = vrot.lane.b32.xlu0 %v815_v3, %s758_s7 }
  0x24   :  { %207 = vrot.lane.b32.xlu1 %v833_v7, %s759_s8  ;;  %205 = vrot.lane.b32.xlu0 %v818_v4, %s759_s8 }
  0x28   :  { %211 = vrot.lane.b32.xlu1 %v830_v6, %s759_s8  ;;  %209 = vrot.lane.b32.xlu0 %v815_v3, %s759_s8 }
  0x2c   :  { %245 = vrot.lane.b32.xlu1 %v833_v7, %s760_s9  ;;  %243 = vrot.lane.b32.xlu0 %v818_v4, %s760_s9 }
  0x30   :  { %249 = vrot.lane.b32.xlu1 %v830_v6, %s760_s9  ;;  %247 = vrot.lane.b32.xlu0 %v815_v3, %s760_s9 }
  0x34   :  { %283 = vrot.lane.b32.xlu1 %v833_v7, %s761_s10  ;;  %281 = vrot.lane.b32.xlu0 %v818_v4, %s761_s10 }
  0x38   :  { %287 = vrot.lane.b32.xlu1 %v830_v6, %s761_s10  ;;  %285 = vrot.lane.b32.xlu0 %v815_v3, %s761_s10 }
  0x3c   :  { %321 = vrot.lane.b32.xlu1 %v833_v7, %s763_s11  ;;  %319 = vrot.lane.b32.xlu0 %v818_v4, %s763_s11 }
  0x40   :  { %325 = vrot.lane.b32.xlu1 %v830_v6, %s763_s11  ;;  %323 = vrot.lane.b32.xlu0 %v815_v3, %s763_s11 }
  0x44   :  { %379 = vperm.xlu0 %754, %v26_v9   ;;  %v984_v9 = vrot.slane %v733_v57, %v912_v18 }
  0x76   :  { %v56_v12 = vpop.permute.xlu1 %55  ;;  %v52_v13 = vpop.permute.xlu0 %51 }
  0x7a   :  { %v58_v19 = vpop.permute.xlu1 %57  ;;  %v54_v21 = vpop.permute.xlu0 %53 }
  0x7b   :  { %v64_v25 = vsel %vm61_vm0, %v52_v13, %v54_v21  ;;  %v65_v31 = vsel %vm61_vm0, %v58_v19, %v52_v13  ;;  %v63_v35 = vsel %vm61_vm0, %v54_v21, %v56_v12  ;;  %v62_v39 = vsel %vm61_vm0, %v56_v12, %v58_v19 }
  0x7c   :  { %v88_v36 = vmul.f32 %v920_v23, %v64_v25  ;;  %v87_v40 = vmul.f32 %v928_v26, %v65_v31  ;;  %v89_v44 = vmul.f32 %v931_v27, %v63_v35  ;;  %v90_v50 = vmul.f32 %v944_v34, %v62_v39 }
  0x7d   :  { %v997_v19 = vrot.slane %v734_v58, %v912_v18  ;;  %v1000_v21 = vrot.slane %v734_v58, %v914_v20  ;;  %v1007_v31 = vrot.slane %v734_v58, %v916_v22 }
  0x7e   :  { %v94_v28 = vpop.permute.xlu1 %93  ;;  %v92_v29 = vpop.permute.xlu0 %91 }
  0x7f   :  { %v102_v32 = vsel %vm99_vm1, %v92_v29, %v94_v28 }
  0x80   :  { %v126_v37 = vmul.f32 %v923_v24, %v102_v32 }
  0x82   :  { %v98_v41 = vpop.permute.xlu1 %97  ;;  %v96_v42 = vpop.permute.xlu0 %95  ;;  %v358_v43 = vpack.c.bf16 %v126_v37, %v88_v36 }
  0x83   :  { %v103_v45 = vsel %vm99_vm1, %v98_v41, %v92_v29  ;;  %v100_v46 = vsel %vm99_vm1, %v96_v42, %v98_v41  ;;  %v101_v47 = vsel %vm99_vm1, %v94_v28, %v96_v42 }
  0x84   :  { %v125_v48 = vmul.f32 %v934_v30, %v103_v45  ;;  %v127_v49 = vmul.f32 %v941_v33, %v101_v47  ;;  %399 = vmatprep.subr.bf16.mxu0 %v358_v43  ;;  %v128_v51 = vmul.f32 %v951_v38, %v100_v46 }
  0x86   :  { %v132_v52 = vpop.permute.xlu1 %131  ;;  %v130_v53 = vpop.permute.xlu0 %129  ;;  %v357_v54 = vpack.c.bf16 %v125_v48, %v87_v40  ;;  %v360_v55 = vpack.c.bf16 %v128_v51, %v90_v50  ;;  %v359_v56 = vpack.c.bf16 %v127_v49, %v89_v44  ;;  %v735_v48 = vld [vmem:[%s1340_s1 + $0x14] sm:$0xf] }
  0x87   :  { %v140_v63 = vsel %vm137_vm2, %v130_v53, %v132_v52  ;;  %v1036_v57 = vrot.slane %v735_v48, %v903_v15  ;;  %v1039_v58 = vrot.slane %v735_v48, %v914_v20 }
  0x88   :  { %400 = vmatpush1.bf16.msra.mxu0 %v357_v54  ;;  %440 = vmatprep.subr.bf16.mxu1 %v360_v55  ;;  %v164_v25 = vmul.f32 %v975_v61, %v140_v63  ;;  %v1028_v54 = vrot.slane %v735_v48, %v912_v18  ;;  %v1031_v55 = vrot.slane %v735_v48, %v916_v22  ;;  %v738_v48 = vld [vmem:[%s1340_s1 + $0x20] sm:$0xf] }
  0x89   :  { %441 = vmatpush1.bf16.msra.mxu1 %v359_v56 }
  0x8a   :  { %v136_v59 = vpop.permute.xlu1 %135  ;;  %v134_v60 = vpop.permute.xlu0 %133 }
  0x8b   :  { %v141_v16 = vsel %vm137_vm2, %v136_v59, %v130_v53  ;;  %v139_v28 = vsel %vm137_vm2, %v132_v52, %v134_v60  ;;  %v138_v32 = vsel %vm137_vm2, %v134_v60, %v136_v59 }
  0x8c   :  { %v163_v35 = vmul.f32 %v984_v9, %v141_v16  ;;  %v165_v40 = vmul.f32 %v987_v10, %v139_v28  ;;  %v166_v44 = vmul.f32 %v990_v11, %v138_v32 }
  0x8e   :  { %v170_v12 = vpop.permute.xlu1 %169  ;;  %v168_v13 = vpop.permute.xlu0 %167 }
  0x8f   :  { %v178_v17 = vsel %vm175_vm3, %v168_v13, %v170_v12 }
  0x90   :  { %v202_v29 = vmul.f32 %v979_v62, %v178_v17 }
  0x92   :  { %v174_v36 = vpop.permute.xlu1 %173  ;;  %v172_v37 = vpop.permute.xlu0 %171  ;;  %v362_v39 = vpack.c.bf16 %v202_v29, %v164_v25 }
  0x93   :  { %v179_v41 = vsel %vm175_vm3, %v174_v36, %v168_v13  ;;  %v176_v42 = vsel %vm175_vm3, %v172_v37, %v174_v36  ;;  %v177_v43 = vsel %vm175_vm3, %v170_v12, %v172_v37 }
  0x94   :  { %v201_v45 = vmul.f32 %v997_v19, %v179_v41  ;;  %v203_v46 = vmul.f32 %v1000_v21, %v177_v43  ;;  %v204_v47 = vmul.f32 %v1007_v31, %v176_v42  ;;  %401 = vmatprep.subr.bf16.mxu0 %v362_v39  ;;  %v737_v42 = vld [vmem:[%s1340_s1 + $0x1c] sm:$0xf] }
  0x96   :  { %v208_v49 = vpop.permute.xlu1 %207  ;;  %v206_v50 = vpop.permute.xlu0 %205  ;;  %v361_v51 = vpack.c.bf16 %v201_v45, %v163_v35  ;;  %v364_v52 = vpack.c.bf16 %v204_v47, %v166_v44  ;;  %v363_v53 = vpack.c.bf16 %v203_v46, %v165_v40  ;;  %v1077_v47 = vrot.slane %v737_v42, %v912_v18 }
  0x97   :  { %v216_v56 = vsel %vm213_vm4, %v206_v50, %v208_v49 }
  0x98   :  { %402 = vmatpush1.bf16.msra.mxu0 %v361_v51  ;;  %442 = vmatprep.subr.bf16.mxu1 %v364_v52  ;;  %v239_v63 = vmul.f32 %v1028_v54, %v216_v56  ;;  %v1088_v51 = vrot.slane %v737_v42, %v903_v15  ;;  %v1091_v52 = vrot.slane %v737_v42, %v914_v20 }
  0x99   :  { %443 = vmatpush1.bf16.msra.mxu1 %v363_v53 }
  0x9a   :  { %v212_v59 = vpop.permute.xlu1 %211  ;;  %v210_v60 = vpop.permute.xlu0 %209  ;;  %v365_v39 = vpack.c.bf16 %v239_v63, %v818_v4 }
  0x9b   :  { %v217_v12 = vsel %vm213_vm4, %v212_v59, %v206_v50  ;;  %v214_v13 = vsel %vm213_vm4, %v210_v60, %v212_v59  ;;  %v215_v16 = vsel %vm213_vm4, %v208_v49, %v210_v60  ;;  %v1085_v50 = vrot.slane %v737_v42, %v916_v22 }
  0x9c   :  { %v242_v17 = vmul.f32 %v1031_v55, %v217_v12  ;;  %v240_v25 = vmul.f32 %v1036_v57, %v215_v16  ;;  %v241_v28 = vmul.f32 %v1039_v58, %v214_v13  ;;  %v1104_v16 = vrot.slane %v738_v48, %v912_v18 }
  0x9e   :  { %v246_v29 = vpop.permute.xlu1 %245  ;;  %v244_v32 = vpop.permute.xlu0 %243  ;;  %v366_v35 = vpack.c.bf16 %v240_v25, %v833_v7  ;;  %v368_v36 = vpack.c.bf16 %v242_v17, %v830_v6  ;;  %v367_v37 = vpack.c.bf16 %v241_v28, %v815_v3  ;;  %v736_v7 = vld [vmem:[%s1340_s1 + $0x18] sm:$0xf] }
  0x9f   :  { %v1064_v3 = vrot.slane %v736_v7, %v916_v22  ;;  %v1067_v4 = vrot.slane %v736_v7, %v903_v15  ;;  %v1072_v45 = vrot.slane %v736_v7, %v914_v20  ;;  %v1094_v53 = vrot.slane %v736_v7, %v912_v18 }
  0xa0   :  { %403 = vmatprep.subr.bf16.mxu0 %v366_v35  ;;  %444 = vmatprep.subr.bf16.mxu1 %v368_v36  ;;  %v254_v59 = vsel %vm251_vm6, %v244_v32, %v246_v29 }
  0xa1   :  { %404 = vmatpush1.bf16.msra.mxu0 %v365_v39  ;;  %445 = vmatpush1.bf16.msra.mxu1 %v367_v37  ;;  %v277_v37 = vmul.f32 %v1094_v53, %v254_v59 }
  0xa2   :  { %v250_v40 = vpop.permute.xlu1 %249  ;;  %v248_v41 = vpop.permute.xlu0 %247 }
  0xa3   :  { %v255_v44 = vsel %vm251_vm6, %v250_v40, %v244_v32  ;;  %v253_v46 = vsel %vm251_vm6, %v246_v29, %v248_v41  ;;  %v252_v56 = vsel %vm251_vm6, %v248_v41, %v250_v40 }
  0xa4   :  { %v280_v60 = vmul.f32 %v1064_v3, %v255_v44  ;;  %v278_v63 = vmul.f32 %v1067_v4, %v253_v46  ;;  %v279_v32 = vmul.f32 %v1072_v45, %v252_v56  ;;  %v1128_v56 = vrot.slane %v738_v48, %v914_v20 }
  0xa6   :  { %v284_v6 = vpop.permute.xlu1 %283  ;;  %v282_v43 = vpop.permute.xlu0 %281 }
  0xa7   :  { %v292_v49 = vsel %vm289_vm5, %v282_v43, %v284_v6 }
  0xa8   :  { %v315_v17 = vmul.f32 %v1077_v47, %v292_v49  ;;  %v1125_v49 = vrot.slane %v738_v48, %v903_v15 }
  0xaa   :  { %v288_v12 = vpop.permute.xlu1 %287  ;;  %v286_v13 = vpop.permute.xlu0 %285  ;;  %v369_v44 = vpack.c.bf16 %v315_v17, %v277_v37 }
  0xab   :  { %v293_v25 = vsel %vm289_vm5, %v288_v12, %v282_v43  ;;  %v290_v28 = vsel %vm289_vm5, %v286_v13, %v288_v12  ;;  %v291_v29 = vsel %vm289_vm5, %v284_v6, %v286_v13  ;;  %v1121_v6 = vrot.slane %v738_v48, %v916_v22 }
  0xac   :  { %v318_v35 = vmul.f32 %v1085_v50, %v293_v25  ;;  %v316_v36 = vmul.f32 %v1088_v51, %v291_v29  ;;  %v317_v18 = vmul.f32 %v1091_v52, %v290_v28 }
  0xae   :  { %v322_v39 = vpop.permute.xlu1 %321  ;;  %v320_v40 = vpop.permute.xlu0 %319  ;;  %v370_v41 = vpack.c.bf16 %v316_v36, %v278_v63  ;;  %v372_v42 = vpack.c.bf16 %v318_v35, %v280_v60  ;;  %v371_v7 = vpack.c.bf16 %v317_v18, %v279_v32  ;;  %v24_v35 = vld [vmem:[%s1341_s2] sm:$0xf] }
  0xaf   :  { %v330_v43 = vsel %vm327_vm7, %v320_v40, %v322_v39 }
  0xb0   :  { %v353_v46 = vmul.f32 %v1104_v16, %v330_v43  ;;  %405 = vmatprep.subr.bf16.mxu0 %v370_v41  ;;  %446 = vmatprep.subr.bf16.mxu1 %v372_v42 }
  0xb1   :  { %406 = vmatpush1.bf16.msra.mxu0 %v369_v44  ;;  %447 = vmatpush1.bf16.msra.mxu1 %v371_v7 }
  0xb2   :  { %v326_v59 = vpop.permute.xlu1 %325  ;;  %v324_v60 = vpop.permute.xlu0 %323  ;;  %v373_v13 = vpack.c.bf16 %v353_v46, %v353_v46 }
  0xb3   :  { %v331_v63 = vsel %vm327_vm7, %v326_v59, %v320_v40  ;;  %v328_v22 = vsel %vm327_vm7, %v324_v60, %v326_v59  ;;  %v329_v12 = vsel %vm327_vm7, %v322_v39, %v324_v60 }
  0xb4   :  { %v356_v15 = vmul.f32 %v1121_v6, %v331_v63  ;;  %v354_v17 = vmul.f32 %v1125_v49, %v329_v12  ;;  %v355_v20 = vmul.f32 %v1128_v56, %v328_v22  ;;  %v388_v29 = vsel %vm386_vm8, %v373_v13, 0  ;;  %v27_v13 = vld [vmem:[%s1342_s5] sm:$0xff] }
  0xb6   :  { %v376_v48 = vpack.c.bf16 %v356_v15, %v356_v15  ;;  %v374_v25 = vpack.c.bf16 %v354_v17, %v354_v17  ;;  %v375_v28 = vpack.c.bf16 %v355_v20, %v355_v20 }
  0xb8   :  { %739 = vmatprep.subr.msk.bf16.mxu0 %vm386_vm8, %v374_v25  ;;  %741 = vmatprep.subr.msk.bf16.mxu1 %vm386_vm8, %v376_v48  ;;  %v394_v32 = vsel %vm386_vm8, %v375_v28, 0 }
  0xb9   :  { %408 = vmatpush1.bf16.msra.mxu0 %v388_v29  ;;  %449 = vmatpush1.bf16.msra.mxu1 %v394_v32 }
  0xbc   :  { %740 = vmatmul.mubr.msk.bf16.vlgmr.msra.gmra.mrb[0].mxu0 %vm382_vm9, %v24_v35  ;;  %742 = vmatmul.mubr.msk.bf16.vlgmr.msra.gmra.mrb[0].mxu1 %vm382_vm9, %v24_v35 }
  0xbd   :  { %674 = vmatprep.mubr.bf16.mxu0 %v762_v8  ;;  %715 = vmatprep.mubr.bf16.mxu1 %v762_v8 }
  0xc3   :  { %v380_v36 = vpop.permute.xlu0 %379 }
 0x18f   :  { %v433_v18 = vpop.f32.mrb[0].mxu0  ;;  %v474_v37 = vpop.f32.mrb[0].mxu1 }
 0x190   :  { %v434_v39 = vadd.f32 %v433_v18, %v380_v36  ;;  %v475_v40 = vadd.f32 %v474_v37, %v380_v36  ;;  %v435_v41 = vpop.f32.mrb[1].mxu0  ;;  %v476_v42 = vpop.f32.mrb[1].mxu1 }
 0x191   :  { %v437_v7 = vpop.f32.mrb[2].mxu0  ;;  %v478_v43 = vpop.f32.mrb[2].mxu1  ;;  %v436_v59 = vadd.f32 %v435_v41, %v380_v36  ;;  %v477_v22 = vadd.f32 %v476_v42, %v380_v36 }
 0x192   :  { %v1144_v44 = vmax.f32 %v434_v39, 0.0  ;;  %v1146_v46 = vmax.f32 %v475_v40, 0.0  ;;  %v438_v60 = vpop.f32.mrb[3].mxu0  ;;  %v479_v63 = vpop.f32.mrb[3].mxu1 }
 0x193   :  { %v1152_v8 = vmax.f32 %v436_v59, 0.0  ;;  %v1158_v12 = vmax.f32 %v477_v22, 0.0 }
 0x194   :  { %489 = vrot.lane.b32.xlu0 %v1146_v46, %s755_s29  ;;  %485 = vrot.lane.b32.xlu1 %v1144_v44, %s755_s29 }
 0x198   :  { %501 = vrot.lane.b32.xlu0 %v1144_v44, %s756_s0  ;;  %487 = vrot.lane.b32.xlu1 %v1152_v8, %s755_s29 }
 0x19c   :  { %505 = vrot.lane.b32.xlu0 %v1146_v46, %s756_s0  ;;  %491 = vrot.lane.b32.xlu1 %v1158_v12, %s755_s29 }
 0x1a0   :  { %517 = vrot.lane.b32.xlu0 %v1144_v44, %s757_s30  ;;  %503 = vrot.lane.b32.xlu1 %v1152_v8, %s756_s0 }
 0x1a4   :  { %521 = vrot.lane.b32.xlu0 %v1146_v46, %s757_s30  ;;  %507 = vrot.lane.b32.xlu1 %v1158_v12, %s756_s0 }
 0x1a8   :  { %533 = vrot.lane.b32.xlu0 %v1144_v44, %s758_s7  ;;  %519 = vrot.lane.b32.xlu1 %v1152_v8, %s757_s30 }
 0x1ac   :  { %537 = vrot.lane.b32.xlu0 %v1146_v46, %s758_s7  ;;  %523 = vrot.lane.b32.xlu1 %v1158_v12, %s757_s30 }
 0x1b0   :  { %549 = vrot.lane.b32.xlu0 %v1144_v44, %s759_s8  ;;  %535 = vrot.lane.b32.xlu1 %v1152_v8, %s758_s7 }
 0x1b4   :  { %553 = vrot.lane.b32.xlu0 %v1146_v46, %s759_s8  ;;  %539 = vrot.lane.b32.xlu1 %v1158_v12, %s758_s7 }
 0x1b8   :  { %565 = vrot.lane.b32.xlu0 %v1144_v44, %s760_s9  ;;  %551 = vrot.lane.b32.xlu1 %v1152_v8, %s759_s8 }
 0x1bc   :  { %569 = vrot.lane.b32.xlu0 %v1146_v46, %s760_s9  ;;  %555 = vrot.lane.b32.xlu1 %v1158_v12, %s759_s8 }
 0x1c0   :  { %581 = vrot.lane.b32.xlu0 %v1144_v44, %s761_s10  ;;  %567 = vrot.lane.b32.xlu1 %v1152_v8, %s760_s9 }
 0x1c4   :  { %585 = vrot.lane.b32.xlu0 %v1146_v46, %s761_s10  ;;  %571 = vrot.lane.b32.xlu1 %v1158_v12, %s760_s9 }
 0x1c8   :  { %597 = vrot.lane.b32.xlu0 %v1144_v44, %s763_s11  ;;  %583 = vrot.lane.b32.xlu1 %v1152_v8, %s761_s10 }
 0x1cc   :  { %601 = vrot.lane.b32.xlu0 %v1146_v46, %s763_s11  ;;  %587 = vrot.lane.b32.xlu1 %v1158_v12, %s761_s10 }
 0x1d0   :  { %635 = vperm.xlu0 %754, %v27_v13   ;;  %599 = vrot.lane.b32.xlu1 %v1152_v8, %s763_s11 }
 0x1d4   :  { %603 = vrot.lane.b32.xlu1 %v1158_v12, %s763_s11 }
 0x206   :  { %v490_v15 = vpop.permute.xlu0 %489  ;;  %v486_v17 = vpop.permute.xlu1 %485 }
 0x20a   :  { %v502_v20 = vpop.permute.xlu0 %501  ;;  %v488_v48 = vpop.permute.xlu1 %487 }
 0x20b   :  { %v495_v29 = vsel %vm61_vm0, %v486_v17, %v488_v48  ;;  %v494_v42 = vsel %vm61_vm0, %v488_v48, %v490_v15 }
 0x20c   :  { %v498_v18 = vmul.f32 %v495_v29, %v920_v23 }
 0x20e   :  { %v506_v25 = vpop.permute.xlu0 %505  ;;  %v492_v28 = vpop.permute.xlu1 %491 }
 0x20f   :  { %v493_v40 = vsel %vm61_vm0, %v490_v15, %v492_v28  ;;  %v496_v41 = vsel %vm61_vm0, %v492_v28, %v486_v17  ;;  %v499_v15 = vmul.f32 %v494_v42, %v931_v27 }
 0x210   :  { %v497_v63 = vmul.f32 %v496_v41, %v928_v26  ;;  %v500_v22 = vmul.f32 %v493_v40, %v944_v34 }
 0x212   :  { %v518_v32 = vpop.permute.xlu0 %517  ;;  %v504_v35 = vpop.permute.xlu1 %503 }
 0x213   :  { %v511_v36 = vsel %vm99_vm1, %v502_v20, %v504_v35  ;;  %v510_v37 = vsel %vm99_vm1, %v504_v35, %v506_v25 }
 0x214   :  { %v514_v39 = vmul.f32 %v511_v36, %v923_v24  ;;  %v515_v60 = vmul.f32 %v510_v37, %v941_v33 }
 0x216   :  { %v522_v7 = vpop.permute.xlu0 %521  ;;  %v508_v43 = vpop.permute.xlu1 %507  ;;  %v614_v59 = vpack.c.bf16 %v514_v39, %v498_v18  ;;  %v615_v35 = vpack.c.bf16 %v515_v60, %v499_v15 }
 0x217   :  { %v509_v23 = vsel %vm99_vm1, %v506_v25, %v508_v43  ;;  %v512_v24 = vsel %vm99_vm1, %v508_v43, %v502_v20 }
 0x218   :  { %v513_v13 = vmul.f32 %v512_v24, %v934_v30  ;;  %v516_v17 = vmul.f32 %v509_v23, %v951_v38  ;;  %642 = vmatprep.subr.bf16.mxu0 %v614_v59 }
 0x21a   :  { %v613_v48 = vpack.c.bf16 %v513_v13, %v497_v63  ;;  %v534_v28 = vpop.permute.xlu0 %533  ;;  %v520_v33 = vpop.permute.xlu1 %519  ;;  %v616_v29 = vpack.c.bf16 %v516_v17, %v500_v22 }
 0x21b   :  { %v527_v26 = vsel %vm137_vm2, %v518_v32, %v520_v33  ;;  %v526_v40 = vsel %vm137_vm2, %v520_v33, %v522_v7 }
 0x21c   :  { %643 = vmatpush1.bf16.msra.mxu0 %v613_v48  ;;  %683 = vmatprep.subr.bf16.mxu1 %v616_v29  ;;  %v530_v27 = vmul.f32 %v527_v26, %v975_v61 }
 0x21d   :  { %684 = vmatpush1.bf16.msra.mxu1 %v615_v35 }
 0x21e   :  { %v538_v20 = vpop.permute.xlu0 %537  ;;  %v524_v25 = vpop.permute.xlu1 %523 }
 0x21f   :  { %v525_v37 = vsel %vm137_vm2, %v522_v7, %v524_v25  ;;  %v528_v39 = vsel %vm137_vm2, %v524_v25, %v518_v32  ;;  %v531_v7 = vmul.f32 %v526_v40, %v987_v10 }
 0x220   :  { %v529_v60 = vmul.f32 %v528_v39, %v984_v9  ;;  %v532_v23 = vmul.f32 %v525_v37, %v990_v11 }
 0x222   :  { %v550_v34 = vpop.permute.xlu0 %549  ;;  %v536_v30 = vpop.permute.xlu1 %535 }
 0x223   :  { %v543_v38 = vsel %vm175_vm3, %v534_v28, %v536_v30  ;;  %v542_v36 = vsel %vm175_vm3, %v536_v30, %v538_v20 }
 0x224   :  { %v546_v18 = vmul.f32 %v543_v38, %v979_v62  ;;  %v547_v59 = vmul.f32 %v542_v36, %v1000_v21 }
 0x226   :  { %v554_v41 = vpop.permute.xlu0 %553  ;;  %v540_v42 = vpop.permute.xlu1 %539  ;;  %v618_v43 = vpack.c.bf16 %v546_v18, %v530_v27  ;;  %v619_v17 = vpack.c.bf16 %v547_v59, %v531_v7 }
 0x227   :  { %v541_v61 = vsel %vm175_vm3, %v538_v20, %v540_v42  ;;  %v544_v62 = vsel %vm175_vm3, %v540_v42, %v534_v28 }
 0x228   :  { %v545_v32 = vmul.f32 %v544_v62, %v997_v19  ;;  %v548_v24 = vmul.f32 %v541_v61, %v1007_v31  ;;  %644 = vmatprep.subr.bf16.mxu0 %v618_v43 }
 0x22a   :  { %v617_v63 = vpack.c.bf16 %v545_v32, %v529_v60  ;;  %v566_v22 = vpop.permute.xlu0 %565  ;;  %v552_v21 = vpop.permute.xlu1 %551  ;;  %v620_v13 = vpack.c.bf16 %v548_v24, %v532_v23 }
 0x22b   :  { %v558_v15 = vsel %vm213_vm4, %v552_v21, %v554_v41  ;;  %v559_v9 = vsel %vm213_vm4, %v550_v34, %v552_v21 }
 0x22c   :  { %v561_v11 = vmul.f32 %v559_v9, %v1028_v54  ;;  %v562_v19 = vmul.f32 %v558_v15, %v1036_v57  ;;  %645 = vmatpush1.bf16.msra.mxu0 %v617_v63  ;;  %685 = vmatprep.subr.bf16.mxu1 %v620_v13 }
 0x22d   :  { %686 = vmatpush1.bf16.msra.mxu1 %v619_v17 }
 0x22e   :  { %v621_v10 = vpack.c.bf16 %v561_v11, %v1144_v44  ;;  %v570_v31 = vpop.permute.xlu0 %569  ;;  %v556_v48 = vpop.permute.xlu1 %555  ;;  %v622_v28 = vpack.c.bf16 %v562_v19, %v1152_v8 }
 0x22f   :  { %v557_v33 = vsel %vm213_vm4, %v554_v41, %v556_v48  ;;  %v560_v29 = vsel %vm213_vm4, %v556_v48, %v550_v34 }
 0x230   :  { %v563_v35 = vmul.f32 %v557_v33, %v1039_v58  ;;  %v564_v54 = vmul.f32 %v560_v29, %v1031_v55  ;;  %646 = vmatprep.subr.bf16.mxu0 %v622_v28 }
 0x231   :  { %647 = vmatpush1.bf16.msra.mxu0 %v621_v10 }
 0x232   :  { %v623_v57 = vpack.c.bf16 %v563_v35, %v1146_v46  ;;  %v582_v20 = vpop.permute.xlu0 %581  ;;  %v568_v44 = vpop.permute.xlu1 %567  ;;  %v624_v25 = vpack.c.bf16 %v564_v54, %v1158_v12 }
 0x233   :  { %v574_v30 = vsel %vm251_vm6, %v568_v44, %v570_v31  ;;  %v575_v58 = vsel %vm251_vm6, %v566_v22, %v568_v44 }
 0x234   :  { %687 = vmatprep.subr.bf16.mxu1 %v624_v25  ;;  %v577_v38 = vmul.f32 %v575_v58, %v1094_v53  ;;  %v578_v12 = vmul.f32 %v574_v30, %v1067_v4 }
 0x235   :  { %688 = vmatpush1.bf16.msra.mxu1 %v623_v57 }
 0x236   :  { %v586_v8 = vpop.permute.xlu0 %585  ;;  %v572_v26 = vpop.permute.xlu1 %571 }
 0x237   :  { %v573_v37 = vsel %vm251_vm6, %v570_v31, %v572_v26  ;;  %v576_v39 = vsel %vm251_vm6, %v572_v26, %v566_v22 }
 0x238   :  { %v579_v53 = vmul.f32 %v573_v37, %v1072_v45 }
 0x23a   :  { %v584_v34 = vpop.permute.xlu1 %583  ;;  %v598_v27 = vpop.permute.xlu0 %597 }
 0x23b   :  { %v590_v55 = vsel %vm289_vm5, %v584_v34, %v586_v8  ;;  %v591_v46 = vsel %vm289_vm5, %v582_v20, %v584_v34 }
 0x23c   :  { %v593_v36 = vmul.f32 %v591_v46, %v1077_v47  ;;  %v594_v18 = vmul.f32 %v590_v55, %v1088_v51  ;;  %v580_v47 = vmul.f32 %v576_v39, %v1064_v3 }
 0x23e   :  { %v625_v40 = vpack.c.bf16 %v593_v36, %v577_v38  ;;  %v588_v41 = vpop.permute.xlu1 %587  ;;  %v626_v42 = vpack.c.bf16 %v594_v18, %v578_v12  ;;  %v602_v61 = vpop.permute.xlu0 %601 }
 0x23f   :  { %v589_v43 = vsel %vm289_vm5, %v586_v8, %v588_v41  ;;  %v592_v4 = vsel %vm289_vm5, %v588_v41, %v582_v20 }
 0x240   :  { %v595_v51 = vmul.f32 %v589_v43, %v1091_v52  ;;  %v596_v59 = vmul.f32 %v592_v4, %v1085_v50  ;;  %648 = vmatprep.subr.bf16.mxu0 %v626_v42 }
 0x241   :  { %649 = vmatpush1.bf16.msra.mxu0 %v625_v40 }
 0x242   :  { %v627_v62 = vpack.c.bf16 %v595_v51, %v579_v53  ;;  %v600_v60 = vpop.permute.xlu1 %599  ;;  %v628_v23 = vpack.c.bf16 %v596_v59, %v580_v47 }
 0x243   :  { %v606_v32 = vsel %vm327_vm7, %v600_v60, %v602_v61  ;;  %v607_v24 = vsel %vm327_vm7, %v598_v27, %v600_v60 }
 0x244   :  { %v609_v45 = vmul.f32 %v607_v24, %v1104_v16  ;;  %v610_v3 = vmul.f32 %v606_v32, %v1125_v49  ;;  %689 = vmatprep.subr.bf16.mxu1 %v628_v23  ;;  %v25_v16 = vld [vmem:[%s1343_s4] sm:$0xf] }
 0x245   :  { %690 = vmatpush1.bf16.msra.mxu1 %v627_v62 }
 0x246   :  { %v629_v50 = vpack.c.bf16 %v807_v1, %v609_v45  ;;  %v604_v52 = vpop.permute.xlu1 %603  ;;  %v630_v7 = vpack.c.bf16 %v823_v5, %v610_v3 }
 0x247   :  { %v605_v63 = vsel %vm327_vm7, %v602_v61, %v604_v52  ;;  %v608_v22 = vsel %vm327_vm7, %v604_v52, %v598_v27 }
 0x248   :  { %v611_v21 = vmul.f32 %v605_v63, %v1128_v56  ;;  %v612_v13 = vmul.f32 %v608_v22, %v1121_v6  ;;  %650 = vmatprep.subr.bf16.mxu0 %v630_v7 }
 0x249   :  { %651 = vmatpush1.bf16.msra.mxu0 %v629_v50 }
 0x24a   :  { %v631_v1 = vpack.c.bf16 %v802_v0, %v611_v21  ;;  %v632_v5 = vpack.c.bf16 %v812_v2, %v612_v13 }
 0x24c   :  { %743 = vmatmul.mubr.msk.bf16.vlgmr.msra.gmra.mrb[4].mxu0 %vm638_vm10, %v25_v16  ;;  %691 = vmatprep.subr.bf16.mxu1 %v632_v5 }
 0x24d   :  { %692 = vmatpush1.bf16.msra.mxu1 %v631_v1 }
 0x24f   :  { %v636_v14 = vpop.permute.xlu0 %635 }
 0x250   :  { %744 = vmatmul.mubr.msk.bf16.vlgmr.msra.gmra.mrb[4].mxu1 %vm638_vm10, %v25_v16 }
 0x31f   :  { %v676_v49 = vpop.f32.mrb[4].mxu0 }
 0x320   :  { %v677_v56 = vadd.f32 %v676_v49, %v636_v14  ;;  %v678_v17 = vpop.f32.mrb[5].mxu0 }
 0x321   :  { %v679_v6 = vadd.f32 %v678_v17, %v636_v14  ;;  %v680_v15 = vpop.f32.mrb[6].mxu0 }
 0x322   :  { %724 = vst [vmem:[%s1344_s6] sm:$0xff] %v677_v56  ;;  %v681_v9 = vpop.f32.mrb[7].mxu0 }
 0x323   :  { %725 = vst [vmem:[%s1344_s6 + $0x8] sm:$0xff] %v679_v6  ;;  %v717_v0 = vpop.f32.mrb[4].mxu1 }
 0x324   :  { %v718_v2 = vadd.f32 %v717_v0, %v636_v14  ;;  %v719_v11 = vpop.f32.mrb[5].mxu1 }
 0x325   :  { %v720_v19 = vadd.f32 %v719_v11, %v636_v14  ;;  %v721_v10 = vpop.f32.mrb[6].mxu1 }
 0x326   :  { %726 = vst [vmem:[%s1344_s6 + $0x10] sm:$0xff] %v718_v2  ;;  %v722_v31 = vpop.f32.mrb[7].mxu1 }
 0x327   :  { %727 = vst [vmem:[%s1344_s6 + $0x18] sm:$0xff] %v720_v19 }

</bundles_post_ra>
